<compile_context>
chip_gen: v7x
topology: tpu7x:2x2x1
jax: 0.10.0
libtpu: 0.0.40
codegen_flags: <defaults>
</compile_context>

<pallas_src>
import jax
import jax.numpy as jnp
from jax.experimental import pallas as pl
from jax.experimental.pallas import tpu as pltpu


# VMEM budgeting: request a 48 MiB scoped limit (safe on v5e/v6e's 128 MiB and
# v7x's 64 MiB physical VMEM) and size pipeline tiles against ~75% of it.
_VMEM_LIMIT_BYTES = 48 * 1024 * 1024
_VMEM_TILE_BUDGET = 36 * 1024 * 1024
# Cap on the VMEM footprint of the (possibly column-tiled) weight block.
_W_TILE_BYTES_CAP = 16 * 1024 * 1024


def _round_up(x, m):
    return ((x + m - 1) // m) * m


def _linear_relu_kernel(x_ref, w_ref, b_ref, o_ref):
    # x row tile arrives f32; cast to the weight dtype (bf16 fast path) inside
    # the kernel so the HBM stream stays 4 B/elem and the VPU cast hides under
    # the MXU. f32 accumulation via preferred_element_type; f32 epilogue.
    x = x_ref[...].astype(w_ref.dtype)
    acc = jnp.dot(x, w_ref[...], preferred_element_type=jnp.float32)
    acc = acc + b_ref[...]                    # (1, tn) f32 bias, broadcast over rows
    o_ref[...] = jnp.maximum(acc, 0.0).astype(o_ref.dtype)


def prepare_params(w, b, *, use_bf16=True):
    """One-time parameter prep, hoisted out of the per-call forward path.

    Pads nfeat/nhid up to lane-dense multiples of 128 (only if needed) and
    casts W to bf16 for the MXU. Bias stays f32 for the epilogue.
    Returns (w_prepared, b_prepared, nhid).
    """
    nfeat, nhid = w.shape
    assert b.shape == (1, nhid)
    nfeat_p = _round_up(nfeat, 128)
    nhid_p = _round_up(nhid, 128)
    if (nfeat_p, nhid_p) != (nfeat, nhid):
        w = jnp.pad(w, ((0, nfeat_p - nfeat), (0, nhid_p - nhid)))
    if nhid_p != nhid:
        b = jnp.pad(b, ((0, 0), (0, nhid_p - nhid)))
    w = w.astype(jnp.bfloat16 if use_bf16 else w.dtype)
    b = b.astype(jnp.float32)
    return w, b, nhid


def nn_forward(x, w_p, b_p, nhid, *, out_dtype=None, unpad_output=True):
    """relu(x @ W + b) with pre-prepared (padded, bf16) parameters.

    x:   [N, nfeat] float32
    w_p: [nfeat_p, nhid_p] (from prepare_params)
    b_p: [1, nhid_p] float32
    """
    n, nfeat = x.shape
    nfeat_p, nhid_p = w_p.shape
    assert b_p.shape == (1, nhid_p)
    assert nfeat <= nfeat_p
    out_dtype = x.dtype if out_dtype is None else jnp.dtype(out_dtype)

    # Pad the activation feature axis only when it is not already lane-dense.
    if nfeat_p != nfeat:
        x = jnp.pad(x, ((0, 0), (0, nfeat_p - nfeat)))

    x_elt = x.dtype.itemsize
    w_elt = w_p.dtype.itemsize
    o_elt = jnp.dtype(out_dtype).itemsize

    # Column tile: tn == nhid_p keeps W fully VMEM-resident (one HBM read of W);
    # otherwise tile nhid to bound the weight block's VMEM footprint (v7x).
    tn = nhid_p
    if nfeat_p * nhid_p * w_elt > _W_TILE_BYTES_CAP:
        tn = max(128, (_W_TILE_BYTES_CAP // (nfeat_p * w_elt)) // 128 * 128)
    grid_n = pl.cdiv(nhid_p, tn)
    w_bufs = 1 if grid_n == 1 else 2   # grid-invariant W/b -> single buffer

    # Row tile: solve the double-buffered pipeline footprint against the VMEM
    # budget, keep it a multiple of 16 (bf16 MXU LHS), cap at 1024, and keep at
    # least 2 row tiles when possible so the parallel grid axis can shard
    # across the two v7x TensorCores.
    fixed = w_bufs * nfeat_p * tn * w_elt + w_bufs * tn * 4
    per_row = 2 * (nfeat_p * x_elt + tn * o_elt)
    tm = max(16, (_VMEM_TILE_BUDGET - fixed) // per_row)
    tm = min(tm, 1024, _round_up(pl.cdiv(n, 2), 16))
    tm = max(16, (tm // 16) * 16)
    if tm >= n:
        tm = _round_up(n, 8)           # a single row tile covers every row
    grid_m = pl.cdiv(n, tm)

    out_shape = jax.ShapeDtypeStruct((n, nhid_p), out_dtype)

    def run(single_buffer_weights):
        wb_kwargs = (
            dict(pipeline_mode=pl.Buffered(1)) if single_buffer_weights else {}
        )
        grid_spec = pl.GridSpec(
            grid=(grid_m, grid_n),
            in_specs=[
                pl.BlockSpec((tm, nfeat_p), lambda i, j: (i, 0)),        # x row tile
                pl.BlockSpec((nfeat_p, tn), lambda i, j: (0, j), **wb_kwargs),  # W
                pl.BlockSpec((1, tn), lambda i, j: (0, j), **wb_kwargs),        # b
            ],
            out_specs=pl.BlockSpec((tm, tn), lambda i, j: (i, j)),
        )
        return pl.pallas_call(
            _linear_relu_kernel,
            out_shape=out_shape,
            grid_spec=grid_spec,
            compiler_params=pltpu.CompilerParams(
                # Independent row/col tiles -> megacore sharding on v7x;
                # neutral on single-TC v5e/v6e.
                dimension_semantics=("parallel", "parallel"),
                vmem_limit_bytes=_VMEM_LIMIT_BYTES,
            ),
        )(x, w_p, b_p)

    try:
        out = run(single_buffer_weights=(grid_n == 1))
    except Exception:
        # Fallback if pipeline_mode=pl.Buffered(1) is rejected by this build.
        out = run(single_buffer_weights=False)

    if unpad_output and nhid_p != nhid:
        out = out[:, :nhid]
    return out


if __name__ == "__main__":
    # Small shapes consistent with the module: N nodes, nfeat -> nhid.
    N, NFEAT, NHID = 8, 32, 32

    key = jax.random.PRNGKey(0)
    kx, kw, kb = jax.random.split(key, 3)

    x = jax.random.normal(kx, (N, NFEAT), dtype=jnp.float32)
    # Deterministic parameter init (synthetic, not a checkpoint load).
    w = jax.random.normal(kw, (NFEAT, NHID), dtype=jnp.float32) * 0.1
    b = jax.random.normal(kb, (1, NHID), dtype=jnp.float32) * 0.1

    # One-time parameter preparation (pad + bf16 cast), hoisted out of forward.
    w_p, b_p, nhid = prepare_params(w, b, use_bf16=True)

    out = nn_forward(x, w_p, b_p, nhid)
    out = jax.block_until_ready(out)

    # Sanity check vs. pure-JAX f32 reference (bf16 MXU inputs -> loose tol;
    # tolerance is fine at this small nfeat — scale it with sqrt(nfeat) or use
    # use_bf16=False for large feature dims).
    ref = jnp.maximum(x @ w + b, 0.0)
    assert out.shape == (N, NHID)
    assert jnp.allclose(out, ref, atol=5e-2, rtol=5e-2), (
        float(jnp.max(jnp.abs(out - ref))))

    print("KERNEL_OK")
</pallas_src>

<mosaic_0001>
module attributes {stable_mosaic.version = 11 : i64} {
  func.func @_linear_relu_kernel(%arg0: i32, %arg1: i32, %arg2: memref<8x128xf32, #tpu.memory_space<vmem>>, %arg3: memref<128x128xbf16, #tpu.memory_space<vmem>>, %arg4: memref<1x128xf32, #tpu.memory_space<vmem>>, %arg5: memref<8x128xf32, #tpu.memory_space<vmem>>) attributes {dimension_semantics = [#tpu.dimension_semantics<parallel>, #tpu.dimension_semantics<parallel>], iteration_bounds = array<i64: 1, 1>, scalar_prefetch = 0 : i64, scratch_operands = 0 : i64, tpu.core_type = #tpu.core_type<tc>, window_params = [{transform_indices = @transform_0, window_bounds = array<i64: 8, 128>}, {pipeline_mode = #tpu.pipeline_mode<synchronous>, transform_indices = @transform_1, window_bounds = array<i64: 128, 128>}, {pipeline_mode = #tpu.pipeline_mode<synchronous>, transform_indices = @transform_2, window_bounds = array<i64: 1, 128>}, {transform_indices = @transform_3, window_bounds = array<i64: 8, 128>}]} {
    %c0 = arith.constant 0 : index
    %c0_0 = arith.constant 0 : index
    %0 = vector.load %arg2[%c0, %c0_0] : memref<8x128xf32, #tpu.memory_space<vmem>>, vector<8x128xf32>
    %1 = arith.truncf %0 : vector<8x128xf32> to vector<8x128xbf16>
    %c0_1 = arith.constant 0 : index
    %c0_2 = arith.constant 0 : index
    %2 = vector.load %arg3[%c0_1, %c0_2] : memref<128x128xbf16, #tpu.memory_space<vmem>>, vector<128x128xbf16>
    %cst = arith.constant dense<0.000000e+00> : vector<8x128xf32>
    %3 = tpu.matmul %1, %2, %cst {dimension_numbers = #tpu.dot_dimension_numbers<[1], [0], [0], [1], [0, 0, 1, 1], [], []>} : vector<8x128xbf16>, vector<128x128xbf16>, vector<8x128xf32> -> vector<8x128xf32>
    %c0_3 = arith.constant 0 : index
    %c0_4 = arith.constant 0 : index
    %4 = vector.load %arg4[%c0_3, %c0_4] : memref<1x128xf32, #tpu.memory_space<vmem>>, vector<1x128xf32>
    %5 = vector.broadcast %4 : vector<1x128xf32> to vector<8x128xf32>
    %6 = arith.addf %3, %5 : vector<8x128xf32>
    %cst_5 = arith.constant 0.000000e+00 : f32
    %7 = vector.broadcast %cst_5 : f32 to vector<8x128xf32>
    %8 = arith.maximumf %6, %7 : vector<8x128xf32>
    %c0_6 = arith.constant 0 : index
    %c0_7 = arith.constant 0 : index
    %9 = vector.load %arg5[%c0_6, %c0_7] : memref<8x128xf32, #tpu.memory_space<vmem>>, vector<8x128xf32>
    tpu.vector_store %arg5[%c0_6, %c0_7], %8 {strides = array<i32>} : memref<8x128xf32, #tpu.memory_space<vmem>>, vector<8x128xf32>,
    return
  }
  func.func @transform_0(%arg0: i32, %arg1: i32) -> (i32, i32) {
    %c0_i32 = arith.constant 0 : i32
    %c0_i32_0 = arith.constant 0 : i32
    return %arg0, %c0_i32 : i32, i32
  }
  func.func @transform_1(%arg0: i32, %arg1: i32) -> (i32, i32) {
    %c0_i32 = arith.constant 0 : i32
    %c0_i32_0 = arith.constant 0 : i32
    return %c0_i32, %arg1 : i32, i32
  }
  func.func @transform_2(%arg0: i32, %arg1: i32) -> (i32, i32) {
    %c0_i32 = arith.constant 0 : i32
    %c0_i32_0 = arith.constant 0 : i32
    return %c0_i32, %arg1 : i32, i32
  }
  func.func @transform_3(%arg0: i32, %arg1: i32) -> (i32, i32) {
    %c0_i32 = arith.constant 0 : i32
    return %arg0, %arg1 : i32, i32
  }
}

module attributes {stable_mosaic.version = 11 : i64} {
  func.func @_linear_relu_kernel(%arg0: i32, %arg1: i32, %arg2: memref<8x128xf32, #tpu.memory_space<vmem>>, %arg3: memref<128x128xbf16, #tpu.memory_space<vmem>>, %arg4: memref<1x128xf32, #tpu.memory_space<vmem>>, %arg5: memref<8x128xf32, #tpu.memory_space<vmem>>) attributes {dimension_semantics = [#tpu.dimension_semantics<parallel>, #tpu.dimension_semantics<parallel>], iteration_bounds = array<i64: 1, 1>, scalar_prefetch = 0 : i64, scratch_operands = 0 : i64, tpu.core_type = #tpu.core_type<tc>, window_params = [{transform_indices = @transform_0, window_bounds = array<i64: 8, 128>}, {transform_indices = @transform_1, window_bounds = array<i64: 128, 128>}, {transform_indices = @transform_2, window_bounds = array<i64: 1, 128>}, {transform_indices = @transform_3, window_bounds = array<i64: 8, 128>}]} {
    %c0 = arith.constant 0 : index
    %c0_0 = arith.constant 0 : index
    %0 = vector.load %arg2[%c0, %c0_0] : memref<8x128xf32, #tpu.memory_space<vmem>>, vector<8x128xf32>
    %1 = arith.truncf %0 : vector<8x128xf32> to vector<8x128xbf16>
    %c0_1 = arith.constant 0 : index
    %c0_2 = arith.constant 0 : index
    %2 = vector.load %arg3[%c0_1, %c0_2] : memref<128x128xbf16, #tpu.memory_space<vmem>>, vector<128x128xbf16>
    %cst = arith.constant dense<0.000000e+00> : vector<8x128xf32>
    %3 = tpu.matmul %1, %2, %cst {dimension_numbers = #tpu.dot_dimension_numbers<[1], [0], [0], [1], [0, 0, 1, 1], [], []>} : vector<8x128xbf16>, vector<128x128xbf16>, vector<8x128xf32> -> vector<8x128xf32>
    %c0_3 = arith.constant 0 : index
    %c0_4 = arith.constant 0 : index
    %4 = vector.load %arg4[%c0_3, %c0_4] : memref<1x128xf32, #tpu.memory_space<vmem>>, vector<1x128xf32>
    %5 = vector.broadcast %4 : vector<1x128xf32> to vector<8x128xf32>
    %6 = arith.addf %3, %5 : vector<8x128xf32>
    %cst_5 = arith.constant 0.000000e+00 : f32
    %7 = vector.broadcast %cst_5 : f32 to vector<8x128xf32>
    %8 = arith.maximumf %6, %7 : vector<8x128xf32>
    %c0_6 = arith.constant 0 : index
    %c0_7 = arith.constant 0 : index
    %9 = vector.load %arg5[%c0_6, %c0_7] : memref<8x128xf32, #tpu.memory_space<vmem>>, vector<8x128xf32>
    tpu.vector_store %arg5[%c0_6, %c0_7], %8 {strides = array<i32>} : memref<8x128xf32, #tpu.memory_space<vmem>>, vector<8x128xf32>,
    return
  }
  func.func @transform_0(%arg0: i32, %arg1: i32) -> (i32, i32) {
    %c0_i32 = arith.constant 0 : i32
    %c0_i32_0 = arith.constant 0 : i32
    return %arg0, %c0_i32 : i32, i32
  }
  func.func @transform_1(%arg0: i32, %arg1: i32) -> (i32, i32) {
    %c0_i32 = arith.constant 0 : i32
    %c0_i32_0 = arith.constant 0 : i32
    return %c0_i32, %arg1 : i32, i32
  }
  func.func @transform_2(%arg0: i32, %arg1: i32) -> (i32, i32) {
    %c0_i32 = arith.constant 0 : i32
    %c0_i32_0 = arith.constant 0 : i32
    return %c0_i32, %arg1 : i32, i32
  }
  func.func @transform_3(%arg0: i32, %arg1: i32) -> (i32, i32) {
    %c0_i32 = arith.constant 0 : i32
    return %arg0, %arg1 : i32, i32
  }
}

</mosaic_0001>

<bundles_post_ra>
// kernel: tpu_custom_call.1
= control target key start
LH: loop header
LB: loop body
LE: loop exit
PB: predicated region body
PF: predicated region fallthrough
CT: control target
= control target key end

     0   :  { %8 = vsyncpa [#allocation3], 0  ;;  %s371_s0 = inlined_call_operand.hbm [shape: f32[8,128], index: 0, kind: input, shape index: {}]   ;;  %s372_s1 = inlined_call_operand.hbm [shape: bf16[128,128], index: 1, kind: input, shape index: {}]   ;;  %s373_s2 = inlined_call_operand.vmem [shape: f32[1,128], index: 2, kind: input, shape index: {}]   ;;  %s374_s3 = inlined_call_operand.hbm [shape: f32[8,128], index: 3, kind: output, shape index: {}]  }
   0x1   :  { %9 = vsyncpa [#allocation6], 0 }
   0x2   :  { %10 = vsyncpa [#allocation4], 0  ;;  %s298_s12 = smov [#allocation2]   ;;  %s299_s14 = smov [#allocation5]  }
   0x3   :  { %s17_s13 = sshll.u32 %s298_s12, 4  ;;  %s26_s15 = sshll.u32 %s299_s14, 4  ;;  %s18_s13 = int_to_ptr.vmem [resolvable:$true] %s17_s13  ;;  %s325_s15 = int_to_ptr.vmem [resolvable:$true] %s26_s15 }
   0x4   :  { %s226_s18 = scalar_lea.hbm %s371_s0, 128 }
   0x5   :  { %p227_p0 = scmp.ne.s32.totalorder %s371_s0, %s226_s18  ;;  %p230_p1 = scmp.lt.u32.totalorder %s226_s18, %s371_s0 }
   0x7   :  { %p232_p2 = pnand %p230_p1, %p227_p0 }
   0x9   :  { %235 = shalt.err (!%p232_p2)
}
   0xa   :  { %s236_s23 = scalar_lea.vmem %s18_s13, 128  ;;  %p241_p4 = scmp.lt.s32.totalorder %s18_s13, %s18_s13 }
   0xb   :  { %p237_p3 = scmp.ne.s32.totalorder %s18_s13, %s236_s23  ;;  %p242_p5 = scmp.lt.s32.totalorder %s236_s23, %s236_s23 }
   0xd   :  { %p243_p6 = por %p242_p5, %p241_p4 }
   0xf   :  { %p244_p7 = pnand %p243_p6, %p237_p3 }
  0x11   :  { %247 = shalt.err (!%p244_p7)
}
  0x12   :  { %20 = dma.hbm_to_vmem [thread:$0]  %s371_s0, 128, %s18_s13, [#allocation3]  }
  0x13   :  { %s248_s28 = scalar_lea.hbm %s372_s1, 1024 }
  0x14   :  { %p249_p8 = scmp.ne.s32.totalorder %s372_s1, %s248_s28  ;;  %p252_p9 = scmp.lt.u32.totalorder %s248_s28, %s372_s1 }
  0x16   :  { %p254_p10 = pnand %p252_p9, %p249_p8 }
  0x18   :  { %257 = shalt.err (!%p254_p10)
}
  0x19   :  { %s258_s6 = scalar_lea.vmem %s325_s15, 1024  ;;  %p263_p12 = scmp.lt.s32.totalorder %s325_s15, %s325_s15 }
  0x1a   :  { %p259_p11 = scmp.ne.s32.totalorder %s325_s15, %s258_s6  ;;  %p264_p13 = scmp.lt.s32.totalorder %s258_s6, %s258_s6 }
  0x1c   :  { %p265_p0 = por %p264_p13, %p263_p12 }
  0x1e   :  { %p266_p1 = pnand %p265_p0, %p259_p11 }
  0x20   :  { %269 = shalt.err (!%p266_p1)
}
  0x21   :  { %s300_s0 = smov 64   ;;  %s301_s7 = smov 4  }
  0x22   :  { %32 = dma.hbm_to_vmem [thread:$0]  %s372_s1, 1024, %s325_s15, [#allocation6], %s300_s0, %s300_s0, %s301_s7  }
  0x23   :  { %292 = dma.done.wait [#allocation3], 128  }
  0x24   :  { %293 = vsyncadd [#allocation3], 4294967168 }
  0x25   :  { %294 = dma.done.wait [#allocation6], 1024  }
  0x26   :  { %295 = vsyncadd [#allocation6], 4294966272  ;;  %v302_v0 = vmov 0.0   ;;  %vm303_vm0 = vmmov 0   ;;  %v218_v1 = vld [vmem:[#allocation5] sm:$0xff]   ;;  %v219_v2 = vld [vmem:[#allocation5 + $0x8] sm:$0xff]  }
  0x27   :  { %191 = vmatprep.subr.bf16.mxu0 %v302_v0  ;;  %207 = vmatprep.mubr.msk.bf16.mxu0 %vm303_vm0, %v302_v0  ;;  %v220_v3 = vld [vmem:[#allocation5 + $0x10] sm:$0xff]   ;;  %v221_v4 = vld [vmem:[#allocation5 + $0x18] sm:$0xff]   ;;  %v222_v5 = vld [vmem:[#allocation5 + $0x20] sm:$0xff]   ;;  %s304_s11 = smov [#allocation7]  }
  0x28   :  { %192 = vmatpush3.bf16.msra.mxu0 %v218_v1  ;;  %v223_v6 = vld [vmem:[#allocation5 + $0x28] sm:$0xff]   ;;  %v224_v7 = vld [vmem:[#allocation5 + $0x30] sm:$0xff]   ;;  %v225_v8 = vld [vmem:[#allocation5 + $0x38] sm:$0xff]   ;;  %s163_s12 = sshll.u32 %s304_s11, 4  ;;  %s164_s12 = int_to_ptr.vmem [resolvable:$true] %s163_s12 }
  0x29   :  { %193 = vmatprep.subr.bf16.mxu0 %v302_v0  ;;  %v42_v9 = vld [vmem:[#allocation2] sm:$0xff]  ;;  %s270_s13 = scalar_lea.vmem %s164_s12, 128  ;;  %p275_p3 = scmp.lt.s32.totalorder %s164_s12, %s164_s12 }
  0x2a   :  { %v43_v10 = vpack.c.bf16 %v42_v9, %v42_v9  ;;  %v173_v11 = vld [vmem:[%s373_s2] ss:$0 sm:$0xff]  ;;  %p271_p2 = scmp.ne.s32.totalorder %s164_s12, %s270_s13  ;;  %p276_p4 = scmp.lt.s32.totalorder %s270_s13, %s270_s13 }
  0x2c   :  { %194 = vmatpush3.bf16.msra.mxu0 %v219_v2  ;;  %p277_p5 = por %p276_p4, %p275_p3 }
  0x2d   :  { %195 = vmatprep.subr.bf16.mxu0 %v302_v0 }
  0x2e   :  { %p278_p6 = pnand %p277_p5, %p271_p2 }
  0x30   :  { %196 = vmatpush3.bf16.msra.mxu0 %v220_v3 }
  0x31   :  { %197 = vmatprep.subr.bf16.mxu0 %v302_v0 }
  0x34   :  { %198 = vmatpush3.bf16.msra.mxu0 %v221_v4 }
  0x35   :  { %199 = vmatprep.subr.bf16.mxu0 %v302_v0 }
  0x38   :  { %200 = vmatpush3.bf16.msra.mxu0 %v222_v5 }
  0x39   :  { %201 = vmatprep.subr.bf16.mxu0 %v302_v0 }
  0x3c   :  { %202 = vmatpush3.bf16.msra.mxu0 %v223_v6 }
  0x3d   :  { %203 = vmatprep.subr.bf16.mxu0 %v302_v0 }
  0x40   :  { %204 = vmatpush3.bf16.msra.mxu0 %v224_v7 }
  0x41   :  { %205 = vmatprep.subr.bf16.mxu0 %v302_v0 }
  0x44   :  { %206 = vmatpush3.bf16.msra.mxu0 %v225_v8 }
  0x47   :  { %208 = vmatmul.mubr.bf16.vlgmr.msra.gmra.mrb[0].mxu0 %v43_v10 }
 0x11a   :  { %v149_v12 = vpop.f32.mrb[0].mxu0 }
 0x11b   :  { %v150_v13 = vadd.f32 %v173_v11, %v149_v12  ;;  %v209_v14 = vpop.f32.mrb[1].mxu0 }
 0x11c   :  { %v152_v15 = vpop.f32.mrb[2].mxu0 }
 0x11d   :  { %v155_v16 = vmax.f32 %v150_v13, 0.0  ;;  %v210_v17 = vpop.f32.mrb[3].mxu0 }
 0x11f   :  { %156 = vst [vmem:[#allocation7] sm:$0xff] %v155_v16 }
 0x120   :  { %281 = shalt.err (!%p278_p6)
}
 0x121   :  { %s282_s2 = scalar_lea.hbm %s374_s3, 128 }
 0x122   :  { %p283_p7 = scmp.ne.s32.totalorder %s374_s3, %s282_s2  ;;  %p286_p8 = scmp.lt.u32.totalorder %s282_s2, %s374_s3 }
 0x124   :  { %p288_p9 = pnand %p286_p8, %p283_p7 }
 0x126   :  { %291 = shalt.err (!%p288_p9)
}
 0x127   :  { %166 = dma.vmem_to_hbm [thread:$0]  %s164_s12, 128, %s374_s3, [#allocation4]  }
 0x128   :  { %296 = dma.done.wait [#allocation4], 128  }
 0x129   :  { %297 = vsyncadd [#allocation4], 4294967168 }
 0x12a   :  { %170 = vsyncpa [#allocation3], 1 }
 0x12b   :  { %171 = vsyncpa [#allocation6], 1 }
 0x12c   :  { %172 = vsyncpa [#allocation4], 1 }

// kernel: tpu_custom_call.1
= control target key start
LH: loop header
LB: loop body
LE: loop exit
PB: predicated region body
PF: predicated region fallthrough
CT: control target
= control target key end

     0   :  { %8 = vsyncpa [#allocation3], 0  ;;  %s371_s0 = inlined_call_operand.hbm [shape: f32[8,128], index: 0, kind: input, shape index: {}]   ;;  %s372_s1 = inlined_call_operand.hbm [shape: bf16[128,128], index: 1, kind: input, shape index: {}]   ;;  %s373_s2 = inlined_call_operand.vmem [shape: f32[1,128], index: 2, kind: input, shape index: {}]   ;;  %s374_s3 = inlined_call_operand.hbm [shape: f32[8,128], index: 3, kind: output, shape index: {}]  }
   0x1   :  { %9 = vsyncpa [#allocation6], 0 }
   0x2   :  { %10 = vsyncpa [#allocation4], 0  ;;  %s298_s12 = smov [#allocation2]   ;;  %s299_s14 = smov [#allocation5]  }
   0x3   :  { %s17_s13 = sshll.u32 %s298_s12, 4  ;;  %s26_s15 = sshll.u32 %s299_s14, 4  ;;  %s18_s13 = int_to_ptr.vmem [resolvable:$true] %s17_s13  ;;  %s325_s15 = int_to_ptr.vmem [resolvable:$true] %s26_s15 }
   0x4   :  { %s226_s18 = scalar_lea.hbm %s371_s0, 128 }
   0x5   :  { %p227_p0 = scmp.ne.s32.totalorder %s371_s0, %s226_s18  ;;  %p230_p1 = scmp.lt.u32.totalorder %s226_s18, %s371_s0 }
   0x7   :  { %p232_p2 = pnand %p230_p1, %p227_p0 }
   0x9   :  { %235 = shalt.err (!%p232_p2)
}
   0xa   :  { %s236_s23 = scalar_lea.vmem %s18_s13, 128  ;;  %p241_p4 = scmp.lt.s32.totalorder %s18_s13, %s18_s13 }
   0xb   :  { %p237_p3 = scmp.ne.s32.totalorder %s18_s13, %s236_s23  ;;  %p242_p5 = scmp.lt.s32.totalorder %s236_s23, %s236_s23 }
   0xd   :  { %p243_p6 = por %p242_p5, %p241_p4 }
   0xf   :  { %p244_p7 = pnand %p243_p6, %p237_p3 }
  0x11   :  { %247 = shalt.err (!%p244_p7)
}
  0x12   :  { %20 = dma.hbm_to_vmem [thread:$0]  %s371_s0, 128, %s18_s13, [#allocation3]  }
  0x13   :  { %s248_s28 = scalar_lea.hbm %s372_s1, 1024 }
  0x14   :  { %p249_p8 = scmp.ne.s32.totalorder %s372_s1, %s248_s28  ;;  %p252_p9 = scmp.lt.u32.totalorder %s248_s28, %s372_s1 }
  0x16   :  { %p254_p10 = pnand %p252_p9, %p249_p8 }
  0x18   :  { %257 = shalt.err (!%p254_p10)
}
  0x19   :  { %s258_s6 = scalar_lea.vmem %s325_s15, 1024  ;;  %p263_p12 = scmp.lt.s32.totalorder %s325_s15, %s325_s15 }
  0x1a   :  { %p259_p11 = scmp.ne.s32.totalorder %s325_s15, %s258_s6  ;;  %p264_p13 = scmp.lt.s32.totalorder %s258_s6, %s258_s6 }
  0x1c   :  { %p265_p0 = por %p264_p13, %p263_p12 }
  0x1e   :  { %p266_p1 = pnand %p265_p0, %p259_p11 }
  0x20   :  { %269 = shalt.err (!%p266_p1)
}
  0x21   :  { %s300_s0 = smov 64   ;;  %s301_s7 = smov 4  }
  0x22   :  { %32 = dma.hbm_to_vmem [thread:$0]  %s372_s1, 1024, %s325_s15, [#allocation6], %s300_s0, %s300_s0, %s301_s7  }
  0x23   :  { %292 = dma.done.wait [#allocation3], 128  }
  0x24   :  { %293 = vsyncadd [#allocation3], 4294967168 }
  0x25   :  { %294 = dma.done.wait [#allocation6], 1024  }
  0x26   :  { %295 = vsyncadd [#allocation6], 4294966272  ;;  %v302_v0 = vmov 0.0   ;;  %vm303_vm0 = vmmov 0   ;;  %v218_v1 = vld [vmem:[#allocation5] sm:$0xff]   ;;  %v219_v2 = vld [vmem:[#allocation5 + $0x8] sm:$0xff]  }
  0x27   :  { %191 = vmatprep.subr.bf16.mxu0 %v302_v0  ;;  %207 = vmatprep.mubr.msk.bf16.mxu0 %vm303_vm0, %v302_v0  ;;  %v220_v3 = vld [vmem:[#allocation5 + $0x10] sm:$0xff]   ;;  %v221_v4 = vld [vmem:[#allocation5 + $0x18] sm:$0xff]   ;;  %v222_v5 = vld [vmem:[#allocation5 + $0x20] sm:$0xff]   ;;  %s304_s11 = smov [#allocation7]  }
  0x28   :  { %192 = vmatpush3.bf16.msra.mxu0 %v218_v1  ;;  %v223_v6 = vld [vmem:[#allocation5 + $0x28] sm:$0xff]   ;;  %v224_v7 = vld [vmem:[#allocation5 + $0x30] sm:$0xff]   ;;  %v225_v8 = vld [vmem:[#allocation5 + $0x38] sm:$0xff]   ;;  %s163_s12 = sshll.u32 %s304_s11, 4  ;;  %s164_s12 = int_to_ptr.vmem [resolvable:$true] %s163_s12 }
  0x29   :  { %193 = vmatprep.subr.bf16.mxu0 %v302_v0  ;;  %v42_v9 = vld [vmem:[#allocation2] sm:$0xff]  ;;  %s270_s13 = scalar_lea.vmem %s164_s12, 128  ;;  %p275_p3 = scmp.lt.s32.totalorder %s164_s12, %s164_s12 }
  0x2a   :  { %v43_v10 = vpack.c.bf16 %v42_v9, %v42_v9  ;;  %v173_v11 = vld [vmem:[%s373_s2] ss:$0 sm:$0xff]  ;;  %p271_p2 = scmp.ne.s32.totalorder %s164_s12, %s270_s13  ;;  %p276_p4 = scmp.lt.s32.totalorder %s270_s13, %s270_s13 }
  0x2c   :  { %194 = vmatpush3.bf16.msra.mxu0 %v219_v2  ;;  %p277_p5 = por %p276_p4, %p275_p3 }
  0x2d   :  { %195 = vmatprep.subr.bf16.mxu0 %v302_v0 }
  0x2e   :  { %p278_p6 = pnand %p277_p5, %p271_p2 }
  0x30   :  { %196 = vmatpush3.bf16.msra.mxu0 %v220_v3 }
  0x31   :  { %197 = vmatprep.subr.bf16.mxu0 %v302_v0 }
  0x34   :  { %198 = vmatpush3.bf16.msra.mxu0 %v221_v4 }
  0x35   :  { %199 = vmatprep.subr.bf16.mxu0 %v302_v0 }
  0x38   :  { %200 = vmatpush3.bf16.msra.mxu0 %v222_v5 }
  0x39   :  { %201 = vmatprep.subr.bf16.mxu0 %v302_v0 }
  0x3c   :  { %202 = vmatpush3.bf16.msra.mxu0 %v223_v6 }
  0x3d   :  { %203 = vmatprep.subr.bf16.mxu0 %v302_v0 }
  0x40   :  { %204 = vmatpush3.bf16.msra.mxu0 %v224_v7 }
  0x41   :  { %205 = vmatprep.subr.bf16.mxu0 %v302_v0 }
  0x44   :  { %206 = vmatpush3.bf16.msra.mxu0 %v225_v8 }
  0x47   :  { %208 = vmatmul.mubr.bf16.vlgmr.msra.gmra.mrb[0].mxu0 %v43_v10 }
 0x11a   :  { %v149_v12 = vpop.f32.mrb[0].mxu0 }
 0x11b   :  { %v150_v13 = vadd.f32 %v173_v11, %v149_v12  ;;  %v209_v14 = vpop.f32.mrb[1].mxu0 }
 0x11c   :  { %v152_v15 = vpop.f32.mrb[2].mxu0 }
 0x11d   :  { %v155_v16 = vmax.f32 %v150_v13, 0.0  ;;  %v210_v17 = vpop.f32.mrb[3].mxu0 }
 0x11f   :  { %156 = vst [vmem:[#allocation7] sm:$0xff] %v155_v16 }
 0x120   :  { %281 = shalt.err (!%p278_p6)
}
 0x121   :  { %s282_s2 = scalar_lea.hbm %s374_s3, 128 }
 0x122   :  { %p283_p7 = scmp.ne.s32.totalorder %s374_s3, %s282_s2  ;;  %p286_p8 = scmp.lt.u32.totalorder %s282_s2, %s374_s3 }
 0x124   :  { %p288_p9 = pnand %p286_p8, %p283_p7 }
 0x126   :  { %291 = shalt.err (!%p288_p9)
}
 0x127   :  { %166 = dma.vmem_to_hbm [thread:$0]  %s164_s12, 128, %s374_s3, [#allocation4]  }
 0x128   :  { %296 = dma.done.wait [#allocation4], 128  }
 0x129   :  { %297 = vsyncadd [#allocation4], 4294967168 }
 0x12a   :  { %170 = vsyncpa [#allocation3], 1 }
 0x12b   :  { %171 = vsyncpa [#allocation6], 1 }
 0x12c   :  { %172 = vsyncpa [#allocation4], 1 }

</bundles_post_ra>
